<compile_context>
chip_gen: v7x
topology: tpu7x:2x2x1
jax: 0.10.0
libtpu: 0.0.40
codegen_flags: <defaults>
</compile_context>

<pallas_src>
import functools
import math

import jax
import jax.numpy as jnp
from jax.experimental import pallas as pl
from jax.experimental.pallas import tpu as pltpu

_INV_SQRT2 = 1.0 / math.sqrt(2.0)
_GELU_C = math.sqrt(2.0 / math.pi)
_HALO = 8  # halo rows DMA'd per side (>= 3 needed; 8 keeps sublane alignment)


# --------------------------------------------------------------------------
# pltpu.roll convention probe (jnp.roll-like vs. opposite sign), run once.
# --------------------------------------------------------------------------
def _probe_roll_kernel(x_ref, o_ref):
    o_ref[...] = pltpu.roll(x_ref[...], 1, 0)


@functools.lru_cache(maxsize=None)
def _roll_is_jnp_convention() -> bool:
    x = jnp.arange(8 * 128, dtype=jnp.float32).reshape(8, 128)
    out = pl.pallas_call(
        _probe_roll_kernel,
        out_shape=jax.ShapeDtypeStruct((8, 128), jnp.float32),
    )(x)
    return bool(jnp.array_equal(out, jnp.roll(x, 1, axis=0)))


# --------------------------------------------------------------------------
# Kernel
# --------------------------------------------------------------------------
def _make_kernel(roll_is_jnp: bool, exact_gelu: bool, i_chunk: int):

    def _roll_rows(x, shift_jnp):
        """jnp.roll(x, shift_jnp, axis=0) on the sublane axis via the XLU."""
        n = x.shape[0]
        s = shift_jnp % n
        if not roll_is_jnp:
            s = (n - s) % n
        if s == 0:
            return x
        return pltpu.roll(x, s, 0)

    def kernel(xm_ref, xl_ref, xr_ref,
               dww_ref, dwb_ref, lnw_ref, lnb_ref,
               w1_ref, b1_ref, w2_ref, b2_ref, gamma_ref,
               out_ref):
        TT = out_ref.shape[1]
        C = out_ref.shape[2]
        I = w1_ref.shape[1]
        t = pl.program_id(1)
        nt = pl.num_programs(1)

        main = xm_ref[0]            # (TT, C): conv centre tap, also the residual
        dww = dww_ref[...]          # (7, C)

        # --- depthwise conv1d, kernel 7, padding 3: shifted taps via XLU rolls ---
        rows = jax.lax.broadcasted_iota(jnp.int32, (TT, 1), 0)
        acc = jnp.broadcast_to(dwb_ref[0], (TT, C)) + dww[3, :] * main
        for d in (1, 2, 3):
            # tap +d : x[t + d], valid inside the tile for t < TT - d
            acc = acc + jnp.where(rows < TT - d,
                                  dww[3 + d, :] * _roll_rows(main, -d), 0.0)
            # tap -d : x[t - d], valid inside the tile for t >= d
            acc = acc + jnp.where(rows >= d,
                                  dww[3 - d, :] * _roll_rows(main, d), 0.0)

        # --- halo corrections: only the first / last <=3 rows of the tile ---
        # Select-based masking (no 0*inf hazard); scalar boundary gates fold
        # into the comparison limits so the select predicate stays a vector.
        left = xl_ref[0]            # (8, C): last 8 rows of the previous tile
        right = xr_ref[0]           # (8, C): first 8 rows of the next tile
        r8 = jax.lax.broadcasted_iota(jnp.int32, (8, 1), 0)
        head = jnp.zeros((8, C), jnp.float32)
        tail = jnp.zeros((8, C), jnp.float32)
        for d in (1, 2, 3):
            dl = jnp.where(t > 0, d, 0)           # disable at global left edge
            head = head + jnp.where(r8 < dl,
                                    dww[3 - d, :] * _roll_rows(left, d), 0.0)
            dr = jnp.where(t < nt - 1, 8 - d, 8)  # disable at global right edge
            tail = tail + jnp.where(r8 >= dr,
                                    dww[3 + d, :] * _roll_rows(right, -d), 0.0)

        # Splice the corrections in via two aligned 8-row RMWs on the output
        # block (used here as a staging buffer; it is fully overwritten below).
        out_ref[0] = acc
        out_ref[0, 0:8, :] = out_ref[0, 0:8, :] + head
        out_ref[0, TT - 8:TT, :] = out_ref[0, TT - 8:TT, :] + tail
        xdw = out_ref[0]

        # --- LayerNorm over channels (eps=1e-6), two-pass variance ---
        mean = jnp.mean(xdw, axis=-1, keepdims=True)
        xc = xdw - mean
        var = jnp.mean(xc * xc, axis=-1, keepdims=True)
        xn = xc * jax.lax.rsqrt(var + 1e-6)
        xn = xn * lnw_ref[0] + lnb_ref[0]
        xn16 = xn.astype(jnp.bfloat16)

        # --- pwconv1 -> GELU -> pwconv2, chunked over the intermediate dim ---
        # bf16 operands, f32 MXU accumulation; only a (TT, i_chunk) `h` slab is
        # ever live, so the f32 intermediate never spills at full size.
        y = jnp.zeros((TT, C), jnp.float32)
        for c0 in range(0, I, i_chunk):
            c1 = min(I, c0 + i_chunk)
            h = jnp.dot(xn16, w1_ref[:, c0:c1],
                        preferred_element_type=jnp.float32) + b1_ref[0, c0:c1]
            if exact_gelu:
                h = 0.5 * h * (1.0 + jax.lax.erf(h * _INV_SQRT2))
            else:
                # tanh-approximate GELU: runs on the EUP (free bundle slot).
                u = _GELU_C * (h + 0.044715 * (h * h * h))
                h = 0.5 * h * (1.0 + jnp.tanh(u))
            y = y + jnp.dot(h.astype(jnp.bfloat16), w2_ref[c0:c1, :],
                            preferred_element_type=jnp.float32)
        y = y + b2_ref[0]

        # --- layer scale (gamma) + residual (residual == un-shifted main tile) ---
        out_ref[0] = main + y * gamma_ref[0]

    return kernel


# --------------------------------------------------------------------------
# Wrappers
# --------------------------------------------------------------------------
def convnext_block_ntc(x_ntc, params, *, tt=512, exact_gelu=False, i_chunk=512):
    """Channels-last entry point.  x_ntc: (B, T, C) f32 -> (B, T, C) f32."""
    B, T, C = x_ntc.shape
    w1 = params["w1"]
    w2 = params["w2"]
    if w1.dtype != jnp.bfloat16:
        w1 = w1.astype(jnp.bfloat16)
    if w2.dtype != jnp.bfloat16:
        w2 = w2.astype(jnp.bfloat16)
    I = w1.shape[1]

    # Time tile: multiple of 8 (sublanes).  Default 512 amortizes the per-step
    # pipeline overhead and MXU weight pushes; shrink on v7x if VMEM-bound.
    t8 = -(-T // 8) * 8
    tt = max(8, (min(int(tt), t8) // 8) * 8)
    nt = -(-T // tt)
    t_pad = nt * tt

    # Keep intermediate-dim chunks lane-aligned (multiples of 128).
    i_chunk = max(128, (int(i_chunk) // 128) * 128)

    x = x_ntc.astype(jnp.float32)
    if t_pad != T:
        x = jnp.pad(x, ((0, 0), (0, t_pad - T), (0, 0)))

    tb = tt // 8                 # time-tile size in halo-block (8-row) units
    max_h = t_pad // 8 - 1       # last valid 8-row block index

    main_map = lambda b, t: (b, t, 0)
    left_map = lambda b, t: (b, jnp.maximum(t * tb - 1, 0), 0)
    right_map = lambda b, t: (b, jnp.minimum((t + 1) * tb, max_h), 0)
    const_map = lambda b, t: (0, 0)

    kernel = _make_kernel(_roll_is_jnp_convention(), exact_gelu, i_chunk)

    flops = 4 * B * t_pad * C * I + 40 * B * t_pad * C
    transcendentals = B * t_pad * I
    bytes_accessed = 2 * B * t_pad * C * 4 + 2 * C * I * 2

    out = pl.pallas_call(
        kernel,
        out_shape=jax.ShapeDtypeStruct((B, t_pad, C), jnp.float32),
        grid=(B, nt),
        in_specs=[
            pl.BlockSpec((1, tt, C), main_map),      # main tile (also residual)
            pl.BlockSpec((1, _HALO, C), left_map),   # left halo (same array)
            pl.BlockSpec((1, _HALO, C), right_map),  # right halo (same array)
            pl.BlockSpec((7, C), const_map),         # dw weight   (resident)
            pl.BlockSpec((1, C), const_map),         # dw bias
            pl.BlockSpec((1, C), const_map),         # ln weight
            pl.BlockSpec((1, C), const_map),         # ln bias
            pl.BlockSpec((C, I), const_map),         # pwconv1 W (bf16, resident)
            pl.BlockSpec((1, I), const_map),         # pwconv1 b
            pl.BlockSpec((I, C), const_map),         # pwconv2 W (bf16, resident)
            pl.BlockSpec((1, C), const_map),         # pwconv2 b
            pl.BlockSpec((1, C), const_map),         # gamma
        ],
        out_specs=pl.BlockSpec((1, tt, C), main_map),
        compiler_params=pltpu.CompilerParams(
            dimension_semantics=("parallel", "parallel"),
            vmem_limit_bytes=48 * 1024 * 1024),
        cost_estimate=pl.CostEstimate(
            flops=int(flops),
            transcendentals=int(transcendentals),
            bytes_accessed=int(bytes_accessed)),
    )(
        x, x, x,
        params["dw_w"], params["dw_b"],
        params["ln_w"], params["ln_b"],
        w1, params["b1"],
        w2, params["b2"],
        params["gamma"],
    )
    if t_pad != T:
        out = out[:, :T, :]
    return out


def convnext_block(x_nct, params, *, tt=512, exact_gelu=False, i_chunk=512):
    """PyTorch-compatible NCT entry point: (B, C, T) -> (B, C, T).

    In a full model, keep activations channels-last and call
    convnext_block_ntc directly to avoid these two XLA transposes.
    """
    x_ntc = jnp.transpose(x_nct, (0, 2, 1))
    out = convnext_block_ntc(x_ntc, params, tt=tt, exact_gelu=exact_gelu,
                             i_chunk=i_chunk)
    return jnp.transpose(out, (0, 2, 1))


def reference_forward(x_nct, params):
    """Pure-JAX f32 reference mirroring the PyTorch forward (exact-erf GELU)."""
    x = jnp.transpose(x_nct, (0, 2, 1))                      # (B, T, C)
    T = x.shape[1]
    xp = jnp.pad(x, ((0, 0), (3, 3), (0, 0)))
    acc = params["dw_b"][0]
    for k in range(7):
        acc = acc + xp[:, k:k + T, :] * params["dw_w"][k, :]
    mean = jnp.mean(acc, axis=-1, keepdims=True)
    var = jnp.mean((acc - mean) ** 2, axis=-1, keepdims=True)
    xn = (acc - mean) / jnp.sqrt(var + 1e-6)
    xn = xn * params["ln_w"][0] + params["ln_b"][0]
    h = xn @ params["w1"].astype(jnp.float32) + params["b1"][0]
    h = 0.5 * h * (1.0 + jax.lax.erf(h * _INV_SQRT2))
    y = (h @ params["w2"].astype(jnp.float32) + params["b2"][0]) * params["gamma"][0]
    return jnp.transpose(x + y, (0, 2, 1))


def init_params(key, dim, intermediate_dim, layer_scale_init_value):
    ks = jax.random.split(key, 6)
    # dwconv: Conv1d(dim, dim, 7, groups=dim) weight (dim,1,7) stored as (7,dim).
    dw_w = 0.1 * jax.random.normal(ks[0], (7, dim), jnp.float32)
    dw_b = 0.1 * jax.random.normal(ks[1], (1, dim), jnp.float32)
    ln_w = jnp.ones((1, dim), jnp.float32)
    ln_b = jnp.zeros((1, dim), jnp.float32)
    # pwconv1/2 stored as (in, out) for x @ W; kept in bf16 so no per-call cast.
    w1 = (0.1 * jax.random.normal(ks[2], (dim, intermediate_dim), jnp.float32)
          ).astype(jnp.bfloat16)
    b1 = 0.1 * jax.random.normal(ks[3], (1, intermediate_dim), jnp.float32)
    w2 = (0.1 * jax.random.normal(ks[4], (intermediate_dim, dim), jnp.float32)
          ).astype(jnp.bfloat16)
    b2 = 0.1 * jax.random.normal(ks[5], (1, dim), jnp.float32)
    gamma = layer_scale_init_value * jnp.ones((1, dim), jnp.float32)
    return dict(dw_w=dw_w, dw_b=dw_b, ln_w=ln_w, ln_b=ln_b,
                w1=w1, b1=b1, w2=w2, b2=b2, gamma=gamma)


if __name__ == "__main__":
    B, dim, T = 2, 8, 48
    intermediate_dim = 32
    layer_scale_init_value = 1e-2

    key = jax.random.PRNGKey(0)
    kx, kp = jax.random.split(key)
    x = jax.random.normal(kx, (B, dim, T), jnp.float32)      # NCT like PyTorch
    params = init_params(kp, dim, intermediate_dim, layer_scale_init_value)

    # tt=16 exercises left-boundary, interior, and right-boundary time tiles.
    out = jax.block_until_ready(convnext_block(x, params, tt=16))

    ref = reference_forward(x, params)
    assert out.shape == (B, dim, T)
    # bf16 matmul operands + tanh-approx GELU vs f32/erf reference.
    assert jnp.allclose(out, ref, atol=5e-3, rtol=5e-3), (
        "mismatch vs reference, max abs err = "
        f"{float(jnp.max(jnp.abs(out - ref)))}")

    print("KERNEL_OK")
</pallas_src>

<mosaic_0001>
module attributes {stable_mosaic.version = 11 : i64} {
  func.func @_probe_roll_kernel(%arg0: memref<8x128xf32, #tpu.memory_space<vmem>>, %arg1: memref<8x128xf32, #tpu.memory_space<vmem>>) attributes {dimension_semantics = [], scalar_prefetch = 0 : i64, scratch_operands = 0 : i64, tpu.core_type = #tpu.core_type<tc>} {
    %c0 = arith.constant 0 : index
    %c0_0 = arith.constant 0 : index
    %0 = vector.load %arg0[%c0, %c0_0] : memref<8x128xf32, #tpu.memory_space<vmem>>, vector<8x128xf32>
    %c1_i32 = arith.constant 1 : i32
    %1 = tpu.dynamic_rotate %0 by %c1_i32 dim 0 : vector<8x128xf32>, i32 -> vector<8x128xf32>
    %c0_1 = arith.constant 0 : index
    %c0_2 = arith.constant 0 : index
    %2 = vector.load %arg1[%c0_1, %c0_2] : memref<8x128xf32, #tpu.memory_space<vmem>>, vector<8x128xf32>
    tpu.vector_store %arg1[%c0_1, %c0_2], %1 {strides = array<i32>} : memref<8x128xf32, #tpu.memory_space<vmem>>, vector<8x128xf32>,
    return
  }
}

</mosaic_0001>

<bundles_post_ra>
// kernel: tpu_custom_call.1
= control target key start
LH: loop header
LB: loop body
LE: loop exit
PB: predicated region body
PF: predicated region fallthrough
CT: control target
= control target key end

     0   :  { %6 = vsyncpa [#allocation3], 0  ;;  %s125_s0 = inlined_call_operand.hbm [shape: f32[8,128], index: 0, kind: input, shape index: {}]   ;;  %s126_s1 = inlined_call_operand.hbm [shape: f32[8,128], index: 1, kind: output, shape index: {}]  }
   0x1   :  { %7 = vsyncpa [#allocation4], 0  ;;  %s89_s6 = smov [#allocation2]   ;;  %s41_s10 = scalar_lea.hbm %s125_s0, 128 }
   0x2   :  { %s14_s7 = sshll.u32 %s89_s6, 4  ;;  %p42_p0 = scmp.ne.s32.totalorder %s125_s0, %s41_s10  ;;  %s15_s7 = int_to_ptr.vmem [resolvable:$true] %s14_s7 }
   0x3   :  { %p45_p1 = scmp.lt.u32.totalorder %s41_s10, %s125_s0 }
   0x5   :  { %p47_p2 = pnand %p45_p1, %p42_p0 }
   0x7   :  { %50 = shalt.err (!%p47_p2)
}
   0x8   :  { %s51_s15 = scalar_lea.vmem %s15_s7, 128  ;;  %p56_p4 = scmp.lt.s32.totalorder %s15_s7, %s15_s7 }
   0x9   :  { %p52_p3 = scmp.ne.s32.totalorder %s15_s7, %s51_s15  ;;  %p57_p5 = scmp.lt.s32.totalorder %s51_s15, %s51_s15 }
   0xb   :  { %p58_p6 = por %p57_p5, %p56_p4 }
   0xd   :  { %p59_p7 = pnand %p58_p6, %p52_p3 }
   0xf   :  { %62 = shalt.err (!%p59_p7)
}
  0x10   :  { %17 = dma.hbm_to_vmem [thread:$0]  %s125_s0, 128, %s15_s7, [#allocation3]  }
  0x11   :  { %85 = dma.done.wait [#allocation3], 128  }
  0x12   :  { %86 = vsyncadd [#allocation3], 4294967168  ;;  %s90_s18 = smov [#allocation5]   ;;  %v21_v0 = vld [vmem:[#allocation2] sm:$0xff] }
  0x13   :  { %s30_s19 = sshll.u32 %s90_s18, 4  ;;  %v22_v1 = vrot.slane %v21_v0, 7  ;;  %s31_s19 = int_to_ptr.vmem [resolvable:$true] %s30_s19 }
  0x14   :  { %s63_s20 = scalar_lea.vmem %s31_s19, 128  ;;  %p68_p9 = scmp.lt.s32.totalorder %s31_s19, %s31_s19 }
  0x15   :  { %23 = vst [vmem:[#allocation5] sm:$0xff] %v22_v1  ;;  %p64_p8 = scmp.ne.s32.totalorder %s31_s19, %s63_s20  ;;  %p69_p10 = scmp.lt.s32.totalorder %s63_s20, %s63_s20 }
  0x17   :  { %p70_p11 = por %p69_p10, %p68_p9 }
  0x19   :  { %p71_p12 = pnand %p70_p11, %p64_p8 }
  0x1b   :  { %74 = shalt.err (!%p71_p12)
}
  0x1c   :  { %s75_s23 = scalar_lea.hbm %s126_s1, 128 }
  0x1d   :  { %p76_p13 = scmp.ne.s32.totalorder %s126_s1, %s75_s23  ;;  %p79_p0 = scmp.lt.u32.totalorder %s75_s23, %s126_s1 }
  0x1f   :  { %p81_p1 = pnand %p79_p0, %p76_p13 }
  0x21   :  { %84 = shalt.err (!%p81_p1)
}
  0x22   :  { %33 = dma.vmem_to_hbm [thread:$0]  %s31_s19, 128, %s126_s1, [#allocation4]  }
  0x23   :  { %87 = dma.done.wait [#allocation4], 128  }
  0x24   :  { %88 = vsyncadd [#allocation4], 4294967168 }
  0x25   :  { %37 = vsyncpa [#allocation3], 1 }
  0x26   :  { %38 = vsyncpa [#allocation4], 1 }

</bundles_post_ra>
